<compile_context>
chip_gen: v7x
topology: tpu7x:2x2x1
jax: 0.10.0
libtpu: 0.0.40
codegen_flags: <defaults>
</compile_context>

<pallas_src>
import functools
import operator

import jax
import jax.numpy as jnp
from jax import lax
from jax.experimental import pallas as pl
from jax.experimental.pallas import tpu as pltpu

LANE = 128
_VMEM = pl.BlockSpec(memory_space=pltpu.MemorySpace.VMEM)


def _padding(downsample, kernel_size):
    """Same padding rule as the PyTorch reference."""
    return max(0, int((kernel_size - downsample + 1) // 2))


# ----------------------------------------------------------------------------
# Pallas kernels (all gridless: full arrays resident in VMEM).
# ----------------------------------------------------------------------------
def _matmul_bias_act_kernel(x_ref, w_ref, b_ref, o_ref, *, activation):
    # y = x @ w + b ; w is already (K, N) — no in-kernel transpose / XLU relayout.
    acc = jnp.dot(x_ref[...], w_ref[...], preferred_element_type=jnp.float32)
    acc = acc + b_ref[...]
    if activation == "relu":
        acc = jnp.maximum(acc, 0.0)
    o_ref[...] = acc.astype(o_ref.dtype)


def matmul_bias(x, w_t, b, activation="none"):
    M, K = x.shape
    K2, N = w_t.shape
    assert K == K2
    return pl.pallas_call(
        functools.partial(_matmul_bias_act_kernel, activation=activation),
        out_shape=jax.ShapeDtypeStruct((M, N), x.dtype),
        in_specs=[_VMEM, _VMEM, _VMEM],
        out_specs=_VMEM,
    )(x, w_t, b.reshape(1, N))


def _affine_act_kernel(x_ref, s_ref, t_ref, o_ref, *, activation):
    y = x_ref[...] * s_ref[...] + t_ref[...]
    if activation == "relu":
        y = jnp.maximum(y, 0.0)
    o_ref[...] = y.astype(o_ref.dtype)


def batchnorm1d_act(x, gamma, beta, mean, var, eps=1e-5, activation="none"):
    """Eval-mode BatchNorm1d folded to per-channel scale/shift (+ optional ReLU)."""
    B, C, L = x.shape
    scale = gamma / jnp.sqrt(var + eps)          # (C,)
    shift = beta - mean * scale                  # (C,)
    s2 = jnp.tile(scale, (B,)).reshape(B * C, 1)
    t2 = jnp.tile(shift, (B,)).reshape(B * C, 1)
    y = pl.pallas_call(
        functools.partial(_affine_act_kernel, activation=activation),
        out_shape=jax.ShapeDtypeStruct((B * C, L), x.dtype),
        in_specs=[_VMEM, _VMEM, _VMEM],
        out_specs=_VMEM,
    )(x.reshape(B * C, L), s2, t2)
    return y.reshape(B, C, L)


def _se_kernel(x_ref, w1_ref, w2_ref, o_ref, *, inv_len):
    x = x_ref[...]                                          # (B, C, L)
    pooled = jnp.sum(x, axis=-1) * inv_len                  # adaptive avg-pool -> (B, C)
    h = jnp.maximum(
        jnp.dot(pooled, w1_ref[...], preferred_element_type=jnp.float32), 0.0)
    z = jnp.dot(h, w2_ref[...], preferred_element_type=jnp.float32)
    gate = 1.0 / (1.0 + jnp.exp(-z))                        # sigmoid (EUP)
    o_ref[...] = (x * gate[:, :, None]).astype(o_ref.dtype)


def se_layer(x, w1_t, w2_t):
    B, C, L = x.shape
    return pl.pallas_call(
        functools.partial(_se_kernel, inv_len=1.0 / L),
        out_shape=jax.ShapeDtypeStruct((B, C, L), x.dtype),
        in_specs=[_VMEM, _VMEM, _VMEM],
        out_specs=_VMEM,
    )(x, w1_t, w2_t)


def _add_kernel(a_ref, b_ref, o_ref):
    o_ref[...] = a_ref[...] + b_ref[...]


def residual_add(a, b):
    return pl.pallas_call(
        _add_kernel,
        out_shape=jax.ShapeDtypeStruct(a.shape, a.dtype),
        in_specs=[_VMEM, _VMEM],
        out_specs=_VMEM,
    )(a, b)


def _max_over_leading_kernel(x_ref, o_ref):
    o_ref[...] = jnp.max(x_ref[...], axis=0)


def maxpool1d(x, pool):
    """nn.MaxPool1d(pool, stride=pool): strided slicing is wrapper plumbing, the
    max reduction runs in the kernel."""
    B, C, L = x.shape
    Lo = L // pool
    stacked = jnp.stack([x[:, :, k::pool][:, :, :Lo] for k in range(pool)], axis=0)
    stacked = stacked.reshape(pool, B * C, Lo)
    y = pl.pallas_call(
        _max_over_leading_kernel,
        out_shape=jax.ShapeDtypeStruct((B * C, Lo), x.dtype),
        in_specs=[_VMEM],
        out_specs=_VMEM,
    )(stacked)
    return y.reshape(B, C, Lo)


def conv1d(x, weight, bias, stride=1, padding=0):
    """PyTorch Conv1d semantics via im2col (wrapper) + Pallas MXU matmul kernel.

    x: (B, Cin, L); weight: (Cout, Cin, K) (PyTorch layout); bias: (Cout,) or None.
    """
    B, Cin, L = x.shape
    Cout, Cin2, K = weight.shape
    assert Cin == Cin2
    xp = jnp.pad(x, ((0, 0), (0, 0), (padding, padding)))
    Lout = (L + 2 * padding - K) // stride + 1
    idx = jnp.arange(Lout)[:, None] * stride + jnp.arange(K)[None, :]   # (Lout, K)
    patches = xp[:, :, idx]                                   # (B, Cin, Lout, K)
    patches = patches.transpose(0, 2, 1, 3).reshape(B * Lout, Cin * K)
    w_t = weight.reshape(Cout, Cin * K).T                     # (Cin*K, Cout), pre-transposed
    b = bias if bias is not None else jnp.zeros((Cout,), x.dtype)
    y = matmul_bias(patches, w_t, b)                          # (B*Lout, Cout)
    return y.reshape(B, Lout, Cout).transpose(0, 2, 1)


def _head_kernel(agesex_ref, feat_ref, wa_ref, ba_ref, wpe_ref, wpf_ref, bp_ref,
                 emb_ref, logits_ref):
    # AgeSexEncoding: relu(age_sex @ Wa^T + ba), weight pre-transposed in wrapper.
    emb = jnp.maximum(
        jnp.dot(agesex_ref[...], wa_ref[...], preferred_element_type=jnp.float32)
        + ba_ref[...], 0.0)
    emb_ref[...] = emb.astype(emb_ref.dtype)
    # LinearPredictionStage on concat([emb, feat]):
    #   logits = emb @ Wp[:, :A]^T + feat @ Wp[:, A:]^T + bp   (lane-padded output)
    logits = (jnp.dot(emb, wpe_ref[...], preferred_element_type=jnp.float32)
              + jnp.dot(feat_ref[...], wpf_ref[...], preferred_element_type=jnp.float32)
              + bp_ref[...])
    logits_ref[...] = logits.astype(logits_ref.dtype)


def prediction_head(age_sex, resnet_flat, wa, ba, wp, bp):
    """Fused AgeSexEncoding + concat + LinearPredictionStage.

    wa: (A, 2), ba: (A,), wp: (n_classes, A + F), bp: (n_classes,)  (PyTorch layouts).
    Returns (logits (B, n_classes), features (B, A + F)).
    """
    B = age_sex.shape[0]
    A = wa.shape[0]
    F = resnet_flat.shape[1]
    C = wp.shape[0]
    C_pad = max(LANE, ((C + LANE - 1) // LANE) * LANE)        # lane-dense logits
    wa_t = wa.T                                               # (2, A)
    wpe_t = jnp.zeros((A, C_pad), wp.dtype).at[:, :C].set(wp[:, :A].T)
    wpf_t = jnp.zeros((F, C_pad), wp.dtype).at[:, :C].set(wp[:, A:].T)
    bp_pad = jnp.zeros((1, C_pad), bp.dtype).at[0, :C].set(bp)
    emb, logits_pad = pl.pallas_call(
        _head_kernel,
        out_shape=(jax.ShapeDtypeStruct((B, A), age_sex.dtype),
                   jax.ShapeDtypeStruct((B, C_pad), age_sex.dtype)),
        in_specs=[_VMEM] * 7,
        out_specs=(_VMEM, _VMEM),
    )(age_sex, resnet_flat, wa_t, ba.reshape(1, A), wpe_t, wpf_t, bp_pad)
    features = jnp.concatenate([emb, resnet_flat], axis=1)
    return logits_pad[:, :C], features


# ----------------------------------------------------------------------------
# ECGModel forward (inference mode — Dropout layers are identity).
# ----------------------------------------------------------------------------
def ecg_model_forward(params, traces, age_sex):
    p = params
    K = p["kernel_size"]
    # --- ResNet1d stem ---
    x = conv1d(traces, p["conv1_w"], None, stride=p["ds0"],
               padding=_padding(p["ds0"], K))
    x = batchnorm1d_act(x, *p["bn1"], activation="relu")
    # --- ResBlock1d (first block: no bn1/dropout1) ---
    blk = p["block0"]
    ds = blk["downsample"]
    x_skip = x
    if ds > 1:
        x_skip = maxpool1d(x_skip, ds)
    if blk["conv1x1_w"] is not None:
        x_skip = conv1d(x_skip, blk["conv1x1_w"], blk["conv1x1_b"], stride=1, padding=0)
    x = conv1d(x, blk["conv1_w"], None, stride=1, padding=_padding(1, K))
    x = batchnorm1d_act(x, *blk["bn2"], activation="relu")
    # TODO(synk): dropout2 is a training-time op; identity at inference.
    x = conv1d(x, blk["conv2_w"], blk["conv2_b"], stride=ds, padding=_padding(ds, K))
    x = se_layer(x, blk["se_fc1_w"].T, blk["se_fc2_w"].T)
    x = residual_add(x, x_skip)
    # --- ResNet1d tail ---
    x = batchnorm1d_act(x, *p["bn2"], activation="relu")
    feat_flat = x.reshape(x.shape[0], -1)
    # --- fused AgeSexEncoding + concat + LinearPredictionStage ---
    logits, features = prediction_head(
        age_sex, feat_flat, p["agesex_w"], p["agesex_b"], p["pred_w"], p["pred_b"])
    return logits, features


# ----------------------------------------------------------------------------
# Pure-JAX reference (independent conv / pooling implementations).
# ----------------------------------------------------------------------------
def _conv1d_ref(x, w, b, stride, padding):
    y = lax.conv_general_dilated(
        x, w, window_strides=(stride,), padding=[(padding, padding)],
        dimension_numbers=("NCH", "OIH", "NCH"))
    if b is not None:
        y = y + b[None, :, None]
    return y


def _bn_ref(x, gamma, beta, mean, var, eps=1e-5):
    return ((x - mean[None, :, None]) / jnp.sqrt(var[None, :, None] + eps)
            * gamma[None, :, None] + beta[None, :, None])


def reference_forward(params, traces, age_sex):
    p = params
    K = p["kernel_size"]
    x = _conv1d_ref(traces, p["conv1_w"], None, p["ds0"], _padding(p["ds0"], K))
    x = jax.nn.relu(_bn_ref(x, *p["bn1"]))
    blk = p["block0"]
    ds = blk["downsample"]
    x_skip = x
    if ds > 1:
        B, C, L = x_skip.shape
        x_skip = x_skip[:, :, :(L // ds) * ds].reshape(B, C, L // ds, ds).max(axis=-1)
    if blk["conv1x1_w"] is not None:
        x_skip = _conv1d_ref(x_skip, blk["conv1x1_w"], blk["conv1x1_b"], 1, 0)
    x = _conv1d_ref(x, blk["conv1_w"], None, 1, _padding(1, K))
    x = jax.nn.relu(_bn_ref(x, *blk["bn2"]))
    x = _conv1d_ref(x, blk["conv2_w"], blk["conv2_b"], ds, _padding(ds, K))
    pooled = x.mean(axis=-1)
    h = jax.nn.relu(pooled @ blk["se_fc1_w"].T)
    gate = jax.nn.sigmoid(h @ blk["se_fc2_w"].T)
    x = x * gate[:, :, None] + x_skip
    x = jax.nn.relu(_bn_ref(x, *p["bn2"]))
    feat_flat = x.reshape(x.shape[0], -1)
    emb = jax.nn.relu(age_sex @ p["agesex_w"].T + p["agesex_b"])
    features = jnp.concatenate([emb, feat_flat], axis=1)
    logits = features @ p["pred_w"].T + p["pred_b"]
    return logits, features


# ----------------------------------------------------------------------------
# Deterministic parameter construction (PyTorch layouts, eval-mode BN stats).
# ----------------------------------------------------------------------------
def init_params(key, cfg):
    K = cfg["kernel_size"]
    c0, c1 = cfg["net_filter_size"]
    d0, d1 = cfg["net_downsample_factors"]
    nl = cfg["num_leads"]
    A = cfg["age_sex_output_dim"]
    n_out = cfg["num_outputs"]
    se_r = cfg["se_reduction"]
    final_len = cfg["seq_length"] // functools.reduce(
        operator.mul, cfg["net_downsample_factors"])
    F = c1 * final_len

    keys = iter(jax.random.split(key, 32))

    def w(shape, fan_in):
        return jax.random.uniform(next(keys), shape, jnp.float32,
                                  -1.0, 1.0) / jnp.sqrt(float(fan_in))

    def bn(c):
        g = 1.0 + 0.1 * jax.random.normal(next(keys), (c,), jnp.float32)
        b = 0.1 * jax.random.normal(next(keys), (c,), jnp.float32)
        m = 0.1 * jax.random.normal(next(keys), (c,), jnp.float32)
        v = 1.0 + 0.1 * jax.random.uniform(next(keys), (c,), jnp.float32)
        return (g, b, m, v)

    params = dict(
        kernel_size=K, ds0=d0,
        conv1_w=w((c0, nl, K), nl * K),
        bn1=bn(c0),
        block0=dict(
            downsample=d1,
            conv1_w=w((c1, c0, K), c0 * K),
            bn2=bn(c1),
            conv2_w=w((c1, c1, K), c1 * K),
            conv2_b=w((c1,), c1 * K),
            se_fc1_w=w((c1 // se_r, c1), c1),
            se_fc2_w=w((c1, c1 // se_r), c1 // se_r),
            conv1x1_w=w((c1, c0, 1), c0) if c0 != c1 else None,
            conv1x1_b=w((c1,), c0) if c0 != c1 else None,
        ),
        bn2=bn(c1),
        agesex_w=w((A, 2), 2),
        agesex_b=w((A,), 2),
        pred_w=w((n_out, A + F), A + F),
        pred_b=w((n_out,), A + F),
    )
    return params


if __name__ == "__main__":
    # Small custom config (num_resnet_blks = -1 path of get_resnet):
    # stem conv (64 -> 64) + one ResBlock1d with downsample 2 (64 -> 32).
    cfg = dict(num_leads=8, seq_length=64,
               net_filter_size=[8, 16], net_downsample_factors=[1, 2],
               kernel_size=3, se_reduction=4,
               age_sex_output_dim=32, num_outputs=10)

    key = jax.random.PRNGKey(0)
    kp, kt, ka = jax.random.split(key, 3)
    params = init_params(kp, cfg)

    batch = 2
    traces = jax.random.normal(kt, (batch, cfg["num_leads"], cfg["seq_length"]),
                               dtype=jnp.float32)
    age_sex = jax.random.normal(ka, (batch, 2), dtype=jnp.float32)

    logits, features = ecg_model_forward(params, traces, age_sex)
    jax.block_until_ready((logits, features))

    logits_ref, features_ref = reference_forward(params, traces, age_sex)
    assert logits.shape == (batch, cfg["num_outputs"])
    assert features.shape == (batch, cfg["age_sex_output_dim"]
                              + cfg["net_filter_size"][-1] * (cfg["seq_length"] // 2))
    assert jnp.allclose(logits, logits_ref, atol=1e-3, rtol=1e-3), "logits mismatch"
    assert jnp.allclose(features, features_ref, atol=1e-3, rtol=1e-3), "features mismatch"
    print("KERNEL_OK")
</pallas_src>

<mosaic_0001>
module attributes {stable_mosaic.version = 11 : i64} {
  func.func @_matmul_bias_act_kernel(%arg0: memref<128x24xf32, #tpu.memory_space<vmem>>, %arg1: memref<24x8xf32, #tpu.memory_space<vmem>>, %arg2: memref<1x8xf32, #tpu.memory_space<vmem>>, %arg3: memref<128x8xf32, #tpu.memory_space<vmem>>) attributes {dimension_semantics = [], scalar_prefetch = 0 : i64, scratch_operands = 0 : i64, tpu.core_type = #tpu.core_type<tc>} {
    %c0 = arith.constant 0 : index
    %c0_0 = arith.constant 0 : index
    %0 = vector.load %arg0[%c0, %c0_0] : memref<128x24xf32, #tpu.memory_space<vmem>>, vector<128x24xf32>
    %c0_1 = arith.constant 0 : index
    %c0_2 = arith.constant 0 : index
    %1 = vector.load %arg1[%c0_1, %c0_2] : memref<24x8xf32, #tpu.memory_space<vmem>>, vector<24x8xf32>
    %cst = arith.constant dense<0.000000e+00> : vector<128x8xf32>
    %2 = tpu.matmul %0, %1, %cst {dimension_numbers = #tpu.dot_dimension_numbers<[1], [0], [0], [1], [0, 0, 1, 1], [], []>} : vector<128x24xf32>, vector<24x8xf32>, vector<128x8xf32> -> vector<128x8xf32>
    %c0_3 = arith.constant 0 : index
    %c0_4 = arith.constant 0 : index
    %3 = vector.load %arg2[%c0_3, %c0_4] : memref<1x8xf32, #tpu.memory_space<vmem>>, vector<1x8xf32>
    %4 = vector.broadcast %3 : vector<1x8xf32> to vector<128x8xf32>
    %5 = arith.addf %2, %4 : vector<128x8xf32>
    %c0_5 = arith.constant 0 : index
    %c0_6 = arith.constant 0 : index
    %6 = vector.load %arg3[%c0_5, %c0_6] : memref<128x8xf32, #tpu.memory_space<vmem>>, vector<128x8xf32>
    tpu.vector_store %arg3[%c0_5, %c0_6], %5 {strides = array<i32>} : memref<128x8xf32, #tpu.memory_space<vmem>>, vector<128x8xf32>,
    return
  }
}

</mosaic_0001>

<bundles_post_ra>
// kernel: tpu_custom_call.1
= control target key start
LH: loop header
LB: loop body
LE: loop exit
PB: predicated region body
PF: predicated region fallthrough
CT: control target
= control target key end

     0   :  { %vm40_vm0 = vcmask 195584   ;;  %vm234_vm1 = vcmask 64512   ;;  %s489_s1 = inlined_call_operand.vmem [shape: f32[24,8], index: 1, kind: input, shape index: {}]   ;;  %s490_s0 = inlined_call_operand.vmem [shape: f32[128,24], index: 0, kind: input, shape index: {}]   ;;  %s491_s2 = inlined_call_operand.vmem [shape: f32[1,8], index: 2, kind: input, shape index: {}]   ;;  %s492_s3 = inlined_call_operand.vmem [shape: f32[128,8], index: 3, kind: output, shape index: {}]  }
   0x1   :  { %v30_v0 = vld [vmem:[%s489_s1] sm:$0xff]  ;;  %v31_v1 = vld [vmem:[%s489_s1 + $0x8] sm:$0xff]  ;;  %v32_v5 = vld [vmem:[%s489_s1 + $0x10] sm:$0xff] }
   0x2   :  { %v321_v2 = vpack.c.bf16 %v31_v1, %v30_v0  ;;  %v14_v3 = vld [vmem:[%s490_s0] sm:$0xff]  ;;  %v15_v6 = vld [vmem:[%s490_s0 + $0x8] sm:$0xff]  ;;  %v16_v8 = vld [vmem:[%s490_s0 + $0x10] sm:$0xff] }
   0x3   :  { %v22_v4 = vld [vmem:[%s490_s0 + $0x40] sm:$0xff]  ;;  %297 = vmatprep.mubr.msk.f32.mxu0 %vm40_vm0, %v14_v3  ;;  %v23_v7 = vld [vmem:[%s490_s0 + $0x48] sm:$0xff]  ;;  %v24_v9 = vld [vmem:[%s490_s0 + $0x50] sm:$0xff] }
   0x4   :  { %309 = vmatprep.mubr.msk.f32.mxu1 %vm40_vm0, %v22_v4  ;;  %322 = vmatprep.subr.bf16.mxu0 %v321_v2  ;;  %v17_v10 = vld [vmem:[%s490_s0 + $0x18] sm:$0xff]  ;;  %v18_v12 = vld [vmem:[%s490_s0 + $0x20] sm:$0xff]  ;;  %v19_v14 = vld [vmem:[%s490_s0 + $0x28] sm:$0xff] }
   0x5   :  { %325 = vmatprep.subr.bf16.mxu1 %v321_v2  ;;  %324 = vmatpush3.bf16.msra.mxu0 %v321_v2  ;;  %v25_v11 = vld [vmem:[%s490_s0 + $0x58] sm:$0xff]  ;;  %v26_v13 = vld [vmem:[%s490_s0 + $0x60] sm:$0xff]  ;;  %v27_v15 = vld [vmem:[%s490_s0 + $0x68] sm:$0xff] }
   0x6   :  { %327 = vmatpush3.bf16.msra.mxu1 %v321_v2  ;;  %295 = vmatprep.subr.mxu0 %v32_v5  ;;  %v20_v16 = vld [vmem:[%s490_s0 + $0x30] sm:$0xff]  ;;  %v21_v18 = vld [vmem:[%s490_s0 + $0x38] sm:$0xff]  ;;  %v255_v20 = vld [vmem:[%s491_s2] ss:$0 sm:$0xff] }
   0x7   :  { %326 = vmatprep.subr.mxu1 %v32_v5  ;;  %v28_v17 = vld [vmem:[%s490_s0 + $0x70] sm:$0xff]  ;;  %v29_v19 = vld [vmem:[%s490_s0 + $0x78] sm:$0xff] }
   0x9   :  { %296 = vmatpush3.msra.mxu0 %v32_v5 }
   0xa   :  { %328 = vmatpush3.msra.mxu1 %v32_v5  ;;  %298 = vmatmul.mubr.msk.f32.vlgmr.msra.gmra.mrb[0].mxu0 %vm40_vm0, %v15_v6 }
   0xb   :  { %310 = vmatmul.mubr.msk.f32.vlgmr.msra.gmra.mrb[0].mxu1 %vm40_vm0, %v23_v7  ;;  %300 = vmatprep.mubr.msk.f32.mxu0 %vm40_vm0, %v16_v8 }
   0xc   :  { %312 = vmatprep.mubr.msk.f32.mxu1 %vm40_vm0, %v24_v9 }
   0xe   :  { %301 = vmatmul.mubr.msk.f32.gmra.mrb[2].mxu0 %vm40_vm0, %v17_v10 }
   0xf   :  { %313 = vmatmul.mubr.msk.f32.gmra.mrb[2].mxu1 %vm40_vm0, %v25_v11  ;;  %303 = vmatprep.mubr.msk.f32.mxu0 %vm40_vm0, %v18_v12 }
  0x10   :  { %315 = vmatprep.mubr.msk.f32.mxu1 %vm40_vm0, %v26_v13 }
  0x12   :  { %304 = vmatmul.mubr.msk.f32.gmra.mrb[4].mxu0 %vm40_vm0, %v19_v14 }
  0x13   :  { %316 = vmatmul.mubr.msk.f32.gmra.mrb[4].mxu1 %vm40_vm0, %v27_v15  ;;  %306 = vmatprep.mubr.msk.f32.mxu0 %vm40_vm0, %v20_v16 }
  0x14   :  { %318 = vmatprep.mubr.msk.f32.mxu1 %vm40_vm0, %v28_v17 }
  0x16   :  { %307 = vmatmul.mubr.msk.f32.gmra.mrb[6].mxu0 %vm40_vm0, %v21_v18 }
  0x17   :  { %319 = vmatmul.mubr.msk.f32.gmra.mrb[6].mxu1 %vm40_vm0, %v29_v19 }
  0xdd   :  { %v299_v21 = vpop.f32.mrb[0].mxu0 }
  0xde   :  { %v311_v22 = vpop.f32.mrb[0].mxu1  ;;  %v161_v23 = vadd.f32 %v299_v21, %v255_v20  ;;  %v155_v25 = vpop.f32.mrb[1].mxu0 }
  0xdf   :  { %v201_v24 = vadd.f32 %v311_v22, %v255_v20  ;;  %v195_v26 = vpop.f32.mrb[1].mxu1  ;;  %v156_v27 = vadd.f32 %v255_v20, %v155_v25 }
  0xe0   :  { %v196_v28 = vadd.f32 %v255_v20, %v195_v26  ;;  %236 = vst.msk [vmem:[%s492_s3 + $0x8] sm:$0xff] %vm234_vm1, %v161_v23 }
  0xe1   :  { %244 = vst.msk [vmem:[%s492_s3 + $0x48] sm:$0xff] %vm234_vm1, %v201_v24  ;;  %235 = vst.msk [vmem:[%s492_s3] sm:$0xff] %vm234_vm1, %v156_v27  ;;  %v302_v29 = vpop.f32.mrb[2].mxu0 }
  0xe2   :  { %243 = vst.msk [vmem:[%s492_s3 + $0x40] sm:$0xff] %vm234_vm1, %v196_v28  ;;  %v314_v30 = vpop.f32.mrb[2].mxu1  ;;  %v171_v31 = vadd.f32 %v302_v29, %v255_v20  ;;  %v165_v33 = vpop.f32.mrb[3].mxu0 }
  0xe3   :  { %v211_v32 = vadd.f32 %v314_v30, %v255_v20  ;;  %v205_v34 = vpop.f32.mrb[3].mxu1  ;;  %v166_v35 = vadd.f32 %v255_v20, %v165_v33 }
  0xe4   :  { %v206_v36 = vadd.f32 %v255_v20, %v205_v34  ;;  %238 = vst.msk [vmem:[%s492_s3 + $0x18] sm:$0xff] %vm234_vm1, %v171_v31 }
  0xe5   :  { %246 = vst.msk [vmem:[%s492_s3 + $0x58] sm:$0xff] %vm234_vm1, %v211_v32  ;;  %237 = vst.msk [vmem:[%s492_s3 + $0x10] sm:$0xff] %vm234_vm1, %v166_v35  ;;  %v305_v37 = vpop.f32.mrb[4].mxu0 }
  0xe6   :  { %245 = vst.msk [vmem:[%s492_s3 + $0x50] sm:$0xff] %vm234_vm1, %v206_v36  ;;  %v317_v38 = vpop.f32.mrb[4].mxu1  ;;  %v181_v39 = vadd.f32 %v305_v37, %v255_v20  ;;  %v175_v41 = vpop.f32.mrb[5].mxu0 }
  0xe7   :  { %v221_v40 = vadd.f32 %v317_v38, %v255_v20  ;;  %v215_v42 = vpop.f32.mrb[5].mxu1  ;;  %v176_v43 = vadd.f32 %v255_v20, %v175_v41 }
  0xe8   :  { %v216_v44 = vadd.f32 %v255_v20, %v215_v42  ;;  %240 = vst.msk [vmem:[%s492_s3 + $0x28] sm:$0xff] %vm234_vm1, %v181_v39 }
  0xe9   :  { %248 = vst.msk [vmem:[%s492_s3 + $0x68] sm:$0xff] %vm234_vm1, %v221_v40  ;;  %239 = vst.msk [vmem:[%s492_s3 + $0x20] sm:$0xff] %vm234_vm1, %v176_v43  ;;  %v308_v45 = vpop.f32.mrb[6].mxu0 }
  0xea   :  { %247 = vst.msk [vmem:[%s492_s3 + $0x60] sm:$0xff] %vm234_vm1, %v216_v44  ;;  %v320_v46 = vpop.f32.mrb[6].mxu1  ;;  %v191_v47 = vadd.f32 %v308_v45, %v255_v20  ;;  %v185_v49 = vpop.f32.mrb[7].mxu0 }
  0xeb   :  { %v231_v48 = vadd.f32 %v320_v46, %v255_v20  ;;  %v225_v50 = vpop.f32.mrb[7].mxu1  ;;  %v186_v51 = vadd.f32 %v255_v20, %v185_v49 }
  0xec   :  { %v226_v52 = vadd.f32 %v255_v20, %v225_v50  ;;  %242 = vst.msk [vmem:[%s492_s3 + $0x38] sm:$0xff] %vm234_vm1, %v191_v47 }
  0xed   :  { %250 = vst.msk [vmem:[%s492_s3 + $0x78] sm:$0xff] %vm234_vm1, %v231_v48  ;;  %241 = vst.msk [vmem:[%s492_s3 + $0x30] sm:$0xff] %vm234_vm1, %v186_v51 }
  0xee   :  { %249 = vst.msk [vmem:[%s492_s3 + $0x70] sm:$0xff] %vm234_vm1, %v226_v52 }

</bundles_post_ra>
